<compile_context>
chip_gen: v6e
topology: v6e:2x2x1
jax: 0.10.0
libtpu: 0.0.40
codegen_flags: <defaults>
</compile_context>

<pallas_src>
import functools

import jax
import jax.numpy as jnp
from jax import lax
from jax.experimental import pallas as pl
from jax.experimental.pallas import tpu as pltpu


def _round_up(a, b):
    return (a + b - 1) // b * b


def _conv_gemm_kernel(a_t_ref, w_ref, b_ref, o_ref, acc_ref):
    """One (batch, L-tile, K-tile) step of O_T = W2 @ A_T + bias."""
    k = pl.program_id(2)

    @pl.when(k == 0)
    def _init():
        # Fold the bias into the accumulator init -> added exactly once.
        acc_ref[...] = jnp.broadcast_to(b_ref[...], acc_ref.shape)

    acc_ref[...] += jnp.dot(
        w_ref[...], a_t_ref[...], preferred_element_type=jnp.float32
    )

    @pl.when(k == pl.num_programs(2) - 1)
    def _store():
        o_ref[...] = acc_ref[...].astype(o_ref.dtype)


def downsample_block_forward(x_nchw, weight, bias, *, stride, padding):
    """Forward pass of DownsampleBlock.

    x_nchw : (N, Cin, H, W)      float32
    weight : (Cout, Cin, 3, 3)   float32   (PyTorch conv weight layout)
    bias   : (Cout,)             float32
    returns: (N, Cout, Ho, Wo)   float32
    """
    N, Cin, H, W = x_nchw.shape
    Cout, _, kH, kW = weight.shape
    s, p = stride, padding
    Ho = (H + 2 * p - kH) // s + 1
    Wo = (W + 2 * p - kW) // s + 1
    L = Ho * Wo                      # flattened spatial (lane dim of the output)
    K = kH * kW * Cin                # reduction dim

    # ---- glue (XLA): pad + transposed im2col + weight/bias reshape ----------
    x_p = jnp.pad(x_nchw, ((0, 0), (0, 0), (p, p), (p, p)))
    taps = []
    for kh in range(kH):
        for kw in range(kW):
            taps.append(x_p[:, :, kh:kh + s * Ho:s, kw:kw + s * Wo:s])
    # A_T[n, (kh*kW + kw)*Cin + ci, ho*Wo + wo] = x_p[n, ci, s*ho+kh, s*wo+kw]
    a_t = jnp.concatenate(taps, axis=1).reshape(N, K, L)

    # W2[co, (kh*kW + kw)*Cin + ci] = weight[co, ci, kh, kw]
    w2 = jnp.transpose(weight, (0, 2, 3, 1)).reshape(Cout, K)
    b2 = bias.astype(jnp.float32).reshape(Cout, 1)

    # ---- tiling --------------------------------------------------------------
    cout_p = _round_up(Cout, 8)      # sublane alignment of the output rows

    # K reduction: single block unless large; a split K tile must be a multiple of
    # both 8 (sublanes of A_T block) and 128 (lanes of the W2 block).
    if K > 1024:
        tk = 512
        k_p = _round_up(K, tk)
    else:
        tk = k_p = K

    # Lane tile: prefer 512, never below 128 so stores stay lane-dense.
    tl = min(512, _round_up(L, 128))

    def vmem_bytes(tk_, tl_):
        # double-buffered A_T / W2 / bias / out tiles + f32 accumulator scratch
        return 4 * (2 * tk_ * tl_ + 2 * cout_p * tk_ + 2 * cout_p
                    + 2 * cout_p * tl_ + cout_p * tl_)

    while vmem_bytes(tk, tl) > 12 * (1 << 20) and tl > 128:
        tl = max(128, (tl // 2) // 128 * 128)

    l_p = _round_up(L, tl)

    # Zero-pad to the tiled shapes. Padded K rows/cols contribute nothing; padded
    # Cout rows and L columns are sliced off after the call.
    a_t = jnp.pad(a_t, ((0, 0), (0, k_p - K), (0, l_p - L)))
    w2 = jnp.pad(w2, ((0, cout_p - Cout), (0, k_p - K)))
    b2 = jnp.pad(b2, ((0, cout_p - Cout), (0, 0)))

    grid = (N, l_p // tl, k_p // tk)

    cost = pl.CostEstimate(
        flops=2 * N * l_p * k_p * cout_p,
        transcendentals=0,
        bytes_accessed=4 * (a_t.size + w2.size + b2.size + N * cout_p * l_p),
    )

    out_t = pl.pallas_call(
        _conv_gemm_kernel,
        out_shape=jax.ShapeDtypeStruct((N, cout_p, l_p), x_nchw.dtype),
        grid=grid,
        in_specs=[
            pl.BlockSpec((None, tk, tl), lambda n, l, k: (n, k, l)),   # A_T tile
            pl.BlockSpec((cout_p, tk), lambda n, l, k: (0, k)),        # W2 K-slice
            pl.BlockSpec((cout_p, 1), lambda n, l, k: (0, 0)),         # bias column
        ],
        out_specs=pl.BlockSpec((None, cout_p, tl), lambda n, l, k: (n, 0, l)),
        scratch_shapes=[pltpu.VMEM((cout_p, tl), jnp.float32)],
        compiler_params=pltpu.CompilerParams(
            dimension_semantics=("parallel", "parallel", "arbitrary"),
        ),
        cost_estimate=cost,
    )(a_t, w2, b2)

    # (N, Cout_p, L_p) -> (N, Cout, Ho, Wo): already NCHW-ordered, just un-pad.
    return out_t[:, :Cout, :L].reshape(N, Cout, Ho, Wo)


def _reference_conv(x_nchw, weight, bias, *, stride, padding):
    """Plain-JAX reference (matches torch.nn.Conv2d forward)."""
    out = lax.conv_general_dilated(
        x_nchw, weight,
        window_strides=(stride, stride),
        padding=((padding, padding), (padding, padding)),
        dimension_numbers=("NCHW", "OIHW", "NCHW"),
    )
    return out + bias.reshape(1, -1, 1, 1)


if __name__ == "__main__":
    # DownsampleBlock(in_channels=4, out_channels=8, stride=2, padding=1)
    in_channels, out_channels = 4, 8
    stride, padding = 2, 1

    key = jax.random.PRNGKey(0)
    k_x, k_w, k_b = jax.random.split(key, 3)

    fan_in = in_channels * 3 * 3
    bound = 1.0 / (fan_in ** 0.5)
    weight = jax.random.uniform(
        k_w, (out_channels, in_channels, 3, 3), jnp.float32, -bound, bound)
    bias = jax.random.uniform(
        k_b, (out_channels,), jnp.float32, -bound, bound)

    # input: batch=2, channels=4, spatial=16x16  (NCHW, like PyTorch)
    x = jax.random.normal(k_x, (2, in_channels, 16, 16), jnp.float32)

    fwd = jax.jit(functools.partial(
        downsample_block_forward, stride=stride, padding=padding))
    out = jax.block_until_ready(fwd(x, weight, bias))

    ref = _reference_conv(x, weight, bias, stride=stride, padding=padding)
    assert out.shape == ref.shape == (2, out_channels, 8, 8), out.shape
    assert jnp.allclose(out, ref, atol=2e-5, rtol=2e-5), "mismatch vs reference conv"

    print("KERNEL_OK")
</pallas_src>

<mosaic_0001>
module attributes {stable_mosaic.version = 11 : i64} {
  func.func @_conv_gemm_kernel(%arg0: i32, %arg1: i32, %arg2: i32, %arg3: memref<1x36x128xf32, #tpu.memory_space<vmem>>, %arg4: memref<8x36xf32, #tpu.memory_space<vmem>>, %arg5: memref<8x1xf32, #tpu.memory_space<vmem>>, %arg6: memref<1x8x128xf32, #tpu.memory_space<vmem>>, %arg7: memref<8x128xf32, #tpu.memory_space<vmem>>) attributes {dimension_semantics = [#tpu.dimension_semantics<parallel>, #tpu.dimension_semantics<parallel>, #tpu.dimension_semantics<arbitrary>], iteration_bounds = array<i64: 2, 1, 1>, scalar_prefetch = 0 : i64, scratch_operands = 1 : i64, tpu.core_type = #tpu.core_type<tc>, window_params = [{transform_indices = @transform_0, window_bounds = array<i64: 1, 36, 128>}, {transform_indices = @transform_1, window_bounds = array<i64: 8, 36>}, {pipeline_mode = #tpu.pipeline_mode<synchronous>, transform_indices = @transform_2, window_bounds = array<i64: 8, 1>}, {transform_indices = @transform_3, window_bounds = array<i64: 1, 8, 128>}]} {
    %c0_i32 = arith.constant 0 : i32
    %0 = arith.cmpi eq, %arg2, %c0_i32 : i32
    %1 = arith.extui %0 : i1 to i32
    %c0_i32_0 = arith.constant 0 : i32
    %2 = arith.cmpi ne, %1, %c0_i32_0 : i32
    scf.if %2 {
      %c0_11 = arith.constant 0 : index
      %c0_12 = arith.constant 0 : index
      %13 = vector.load %arg5[%c0_11, %c0_12] : memref<8x1xf32, #tpu.memory_space<vmem>>, vector<8x1xf32>
      %14 = vector.shape_cast %13 : vector<8x1xf32> to vector<8x1xf32>
      %15 = vector.broadcast %14 : vector<8x1xf32> to vector<8x128xf32>
      %c0_13 = arith.constant 0 : index
      %c0_14 = arith.constant 0 : index
      %16 = vector.load %arg7[%c0_13, %c0_14] : memref<8x128xf32, #tpu.memory_space<vmem>>, vector<8x128xf32>
      tpu.vector_store %arg7[%c0_13, %c0_14], %15 {strides = array<i32>} : memref<8x128xf32, #tpu.memory_space<vmem>>, vector<8x128xf32>,
    } else {
    }
    %c0 = arith.constant 0 : index
    %c0_1 = arith.constant 0 : index
    %3 = vector.load %arg7[%c0, %c0_1] : memref<8x128xf32, #tpu.memory_space<vmem>>, vector<8x128xf32>
    %c0_2 = arith.constant 0 : index
    %c0_3 = arith.constant 0 : index
    %4 = vector.load %arg4[%c0_2, %c0_3] : memref<8x36xf32, #tpu.memory_space<vmem>>, vector<8x36xf32>
    %c0_4 = arith.constant 0 : index
    %c0_5 = arith.constant 0 : index
    %c0_6 = arith.constant 0 : index
    %5 = vector.load %arg3[%c0_4, %c0_5, %c0_6] : memref<1x36x128xf32, #tpu.memory_space<vmem>>, vector<1x36x128xf32>
    %6 = vector.shape_cast %5 : vector<1x36x128xf32> to vector<36x128xf32>
    %cst = arith.constant dense<0.000000e+00> : vector<8x128xf32>
    %7 = tpu.matmul %4, %6, %cst {dimension_numbers = #tpu.dot_dimension_numbers<[1], [0], [0], [1], [0, 0, 1, 1], [], []>} : vector<8x36xf32>, vector<36x128xf32>, vector<8x128xf32> -> vector<8x128xf32>
    %8 = arith.addf %3, %7 : vector<8x128xf32>
    %c0_7 = arith.constant 0 : index
    %c0_8 = arith.constant 0 : index
    %9 = vector.load %arg7[%c0_7, %c0_8] : memref<8x128xf32, #tpu.memory_space<vmem>>, vector<8x128xf32>
    tpu.vector_store %arg7[%c0_7, %c0_8], %8 {strides = array<i32>} : memref<8x128xf32, #tpu.memory_space<vmem>>, vector<8x128xf32>,
    %c0_i32_9 = arith.constant 0 : i32
    %10 = arith.cmpi eq, %arg2, %c0_i32_9 : i32
    %11 = arith.extui %10 : i1 to i32
    %c0_i32_10 = arith.constant 0 : i32
    %12 = arith.cmpi ne, %11, %c0_i32_10 : i32
    scf.if %12 {
      %c0_11 = arith.constant 0 : index
      %c0_12 = arith.constant 0 : index
      %13 = vector.load %arg7[%c0_11, %c0_12] : memref<8x128xf32, #tpu.memory_space<vmem>>, vector<8x128xf32>
      %c0_13 = arith.constant 0 : index
      %c0_14 = arith.constant 0 : index
      %c0_15 = arith.constant 0 : index
      %14 = vector.load %arg6[%c0_13, %c0_14, %c0_15] : memref<1x8x128xf32, #tpu.memory_space<vmem>>, vector<1x8x128xf32>
      %15 = vector.shape_cast %14 : vector<1x8x128xf32> to vector<8x128xf32>
      %16 = vector.shape_cast %13 : vector<8x128xf32> to vector<1x8x128xf32>
      tpu.vector_store %arg6[%c0_13, %c0_14, %c0_15], %16 {strides = array<i32>} : memref<1x8x128xf32, #tpu.memory_space<vmem>>, vector<1x8x128xf32>,
    } else {
    }
    return
  }
  func.func @transform_0(%arg0: i32, %arg1: i32, %arg2: i32) -> (i32, i32, i32) {
    %c0_i32 = arith.constant 0 : i32
    return %arg0, %arg2, %arg1 : i32, i32, i32
  }
  func.func @transform_1(%arg0: i32, %arg1: i32, %arg2: i32) -> (i32, i32) {
    %c0_i32 = arith.constant 0 : i32
    %c0_i32_0 = arith.constant 0 : i32
    return %c0_i32, %arg2 : i32, i32
  }
  func.func @transform_2(%arg0: i32, %arg1: i32, %arg2: i32) -> (i32, i32) {
    %c0_i32 = arith.constant 0 : i32
    %c0_i32_0 = arith.constant 0 : i32
    %c0_i32_1 = arith.constant 0 : i32
    return %c0_i32, %c0_i32_0 : i32, i32
  }
  func.func @transform_3(%arg0: i32, %arg1: i32, %arg2: i32) -> (i32, i32, i32) {
    %c0_i32 = arith.constant 0 : i32
    %c0_i32_0 = arith.constant 0 : i32
    return %arg0, %c0_i32, %arg1 : i32, i32, i32
  }
}

</mosaic_0001>

<bundles_post_ra>
// kernel: downsample_block_forward.1
= control target key start
LH: loop header
LB: loop body
LE: loop exit
PB: predicated region body
PF: predicated region fallthrough
CT: control target
= control target key end

     0   :  { %s549_s12 = smov 0   ;;  %s551_s13 = smov 0   ;;  %s588_s0 = inlined_call_operand.vmem [shape: f32[2,36,128], index: 0, kind: input, shape index: {}]   ;;  %s589_s1 = inlined_call_operand.vmem [shape: f32[8,36], index: 1, kind: input, shape index: {}]   ;;  %s590_s2 = inlined_call_operand.vmem [shape: f32[8,1], index: 2, kind: input, shape index: {}]   ;;  %s591_s3 = inlined_call_operand.vmem [shape: f32[2,8,128], index: 3, kind: output, shape index: {}]  }
   0x1   :  { %s553_s14 = smov 0  }
   0x2 LB: > { %s32_s15 = sadd.s32 1, %s520_s13  ;;  %p447_p0 = scmp.ge.s32.totalorder %s524_s14, 1  ;;  %s524_s14 = sphi %s553_s14, %s13_s14   ;;  %s520_s13 = sphi %s551_s13, %s593_s13   ;;  %s516_s12 = sphi %s549_s12, %s592_s12  }
   0x3   : > { %p34_p1 = scmp.ge.s32.totalorder %s32_s15, 2  ;;  %p179_p2 = scmp.lt.s32.totalorder %s524_s14, 3 }
   0x5   : > { %s595_s15 = smov (%p34_p1, %s32_s15), 0  ;;  %p180_p3 = pnand %p447_p0, %p179_p2 }
   0x6   : > { %p217_p4 = scmp.lt.s32.totalorder (!%p180_p3), %s516_s12, 1 }
   0x7   : > { %183 = sbr.rel (%p180_p3) target bundleno = 222 (0xde), region = 32 }
   0xc   : > { %v526_v0 = vmov 0.0   ;;  %vm527_vm0 = vmmov 0   ;;  %v244_v1 = vld [vmem:[%s590_s2] sm:$0xff]  ;;  %s597_s12 = smov (!%p217_p4, %s516_s12), 1  ;;  %v528_v2 = vmov 0   ;;  %vm262_vm1 = vcmask 1043456  }
   0xd   : > { %460 = vmatprep.subr.mxu0 %v526_v0  ;;  %470 = vmatprep.mubr.msk.f32.mxu0 %vm527_vm0, %v526_v0  ;;  %s473_s18 = smul.u32 40, %s597_s12  ;;  %v252_v8 = vld [vmem:[%s589_s1] sm:$0xff]  ;;  %vm258_vm2 = vcmask 293888   ;;  %s449_s24 = sshll.u32 %s597_s12, 3 }
   0xe   : > { %501 = vset.pattern.permute.xlu0 %v528_v2  ;;  %s239_s27 = scalar_lea.vmem %s591_s3, %s449_s24 }
   0xf   : > { %247 = vperm.xlu0 %501, %v244_v1   ;;  %s227_s21 = scalar_lea.vmem %s588_s0, %s473_s18 }
  0x10   : > { %v257_v3 = vld [vmem:[%s227_s21 + $0x20] sm:$0xf]  ;;  %v256_v4 = vld [vmem:[%s227_s21 + $0x18] sm:$0xff]  ;;  %v255_v5 = vld [vmem:[%s227_s21 + $0x10] sm:$0xff] }
  0x11   : > { %461 = vmatpush3.msk.msra.mxu0 %vm262_vm1, %v257_v3  ;;  %v254_v6 = vld [vmem:[%s227_s21 + $0x8] sm:$0xff]  ;;  %v253_v7 = vld [vmem:[%s227_s21] sm:$0xff] }
  0x12   : > { %462 = vmatprep.subr.mxu0 %v526_v0 }
  0x13   : > { %463 = vmatpush3.msra.mxu0 %v256_v4 }
  0x14   : > { %464 = vmatprep.subr.mxu0 %v526_v0 }
  0x15   : > { %465 = vmatpush3.msra.mxu0 %v255_v5 }
  0x16   : > { %466 = vmatprep.subr.mxu0 %v526_v0 }
  0x17   : > { %467 = vmatpush3.msra.mxu0 %v254_v6 }
  0x18   : > { %468 = vmatprep.subr.mxu0 %v526_v0 }
  0x19   : > { %469 = vmatpush3.msra.mxu0 %v253_v7 }
  0x1a   : > { %471 = vmatmul.mubr.msk.f32.vlgmr.msra.gmra.mxu0 %vm258_vm2, %v252_v8 }
  0x8a   : > { %v248_v9 = vpop.permute.xlu0 %247 }
  0xda   : > { %v332_v10 = vpop.f32.mrf.mxu0 }
  0xdb   : > { %v336_v11 = vadd.f32 %v332_v10, %v248_v9 }
  0xdc   : > { %v472_v12 = vpop.f32.mrf.mxu0 }
  0xdd   : > { %342 = vst [vmem:[%s239_s27] sm:$0xff] %v336_v11 }
  0xde PF: > { %s13_s14 = sadd.s32 1, %s524_s14   ;;  %s592_s12 = smov %s520_s13 }
  0xdf   : > { %p10_p5 = scmp.ge.s32.totalorder %s13_s14, 4   ;;  %s593_s13 = smov %s595_s15 }
  0xe1   :  { %12 = sbr.rel (!%p10_p5) target bundleno = 2 (0x2), region = 73 }

</bundles_post_ra>
